<compile_context>
chip_gen: v5e
topology: v5e:2x2
jax: 0.10.0
libtpu: 0.0.40
codegen_flags: <defaults>
</compile_context>

<pallas_src>
import jax
import jax.numpy as jnp
from jax.experimental import pallas as pl
from jax.experimental.pallas import tpu as pltpu


_VMEM_LIMIT = 32 * 1024 * 1024        # explicit scoped-VMEM limit (all chips)
_FAST_PATH_BUDGET = 20 * 1024 * 1024  # conservative across v5e / v6e / v7x


def _round_up(v, m):
    return (v + m - 1) // m * m


def _pick_tc(c_pad, max_tc):
    """Largest multiple of 128 that divides c_pad and is <= max_tc."""
    best = 128
    k = 256
    while k <= min(c_pad, max_tc):
        if c_pad % k == 0:
            best = k
        k += 128
    return best


def prepare_arcsoftmax_w(w, operand_dtype=jnp.bfloat16):
    """F.normalize(w, dim=0) + pad the class dim to a multiple of 128.

    w is a parameter: call this ONCE per parameter update (outside the hot
    path), not per forward call.  Padded columns are exactly zero; the kernels
    rely on that for the padded-column row-sum correction."""
    f, c = w.shape
    w32 = w.astype(jnp.float32)
    inv = jax.lax.rsqrt(
        jnp.maximum(jnp.sum(w32 * w32, axis=0, keepdims=True), 1e-24))
    wn = (w32 * inv).astype(operand_dtype)
    c_pad = _round_up(c, 128)
    if c_pad != c:
        wn = jnp.pad(wn, ((0, 0), (0, c_pad - c)))
    return wn, c


# --------------------------------------------------------------------------
# Fast path: one pallas_call, grid (batch_tiles, class_tiles), z kept in VMEM.
# --------------------------------------------------------------------------
def _fused_kernel(scal_ref, x_ref, w_ref, out_ref, z_ref, rowsum_ref):
    # scal_ref (SMEM f32): [s, s*cos(m), s*sin(m), pad_corr]
    j = pl.program_id(1)
    nc = pl.num_programs(1)
    s = scal_ref[0]

    @pl.when(j == 0)
    def _():
        # running sum of exp(s*z - s); pre-subtract the zero-padded class
        # columns' contribution (each padded column gives exactly exp(-s)).
        rowsum_ref[...] = jnp.zeros_like(rowsum_ref) - scal_ref[3]

    # z = 10 * cosa (the /10 is folded into the scalar coefficients).
    z = jnp.dot(x_ref[...], w_ref[...], preferred_element_type=jnp.float32)
    z_ref[j] = z                               # stash tile in the VMEM slab
    rowsum_ref[...] += jnp.sum(jnp.exp(s * z - s), axis=1, keepdims=True)

    @pl.when(j == nc - 1)
    def _():
        rs = rowsum_ref[...]
        cm = scal_ref[1]
        sm = scal_ref[2]
        n_tiles, _, tc = z_ref.shape
        c_out = out_ref.shape[1]
        for t in range(n_tiles):               # static, unrolled
            lo = t * tc
            hi = min(lo + tc, c_out)
            if hi <= lo:
                continue
            zt = z_ref[t]
            e_cosa = jnp.exp(s * zt - s)
            # exact identity: 10*s*cos(acos(z/10)+m)
            #               = s*cos(m)*z - s*sin(m)*sqrt(100 - z^2)
            sin_t = jnp.sqrt(jnp.maximum(100.0 - zt * zt, 0.0))
            e_m = jnp.exp(cm * zt - sm * sin_t - s)
            denom = rs + e_m - e_cosa
            res = e_m * pl.reciprocal(denom, approx=False)
            out_ref[:, lo:hi] = res[:, : hi - lo]


# --------------------------------------------------------------------------
# General path (large C): pass 1 = row sums only, pass 2 = recompute z + ratio.
# --------------------------------------------------------------------------
def _rowsum_kernel(scal_ref, x_ref, w_ref, rowsum_ref):
    j = pl.program_id(1)
    s = scal_ref[0]

    @pl.when(j == 0)
    def _():
        rowsum_ref[...] = jnp.zeros_like(rowsum_ref) - scal_ref[3]

    z = jnp.dot(x_ref[...], w_ref[...], preferred_element_type=jnp.float32)
    rowsum_ref[...] += jnp.sum(jnp.exp(s * z - s), axis=1, keepdims=True)


def _ratio_kernel(scal_ref, x_ref, w_ref, rowsum_ref, out_ref):
    s = scal_ref[0]
    z = jnp.dot(x_ref[...], w_ref[...], preferred_element_type=jnp.float32)
    e_cosa = jnp.exp(s * z - s)
    sin_t = jnp.sqrt(jnp.maximum(100.0 - z * z, 0.0))
    e_m = jnp.exp(scal_ref[1] * z - scal_ref[2] * sin_t - s)
    denom = rowsum_ref[...] + e_m - e_cosa
    out_ref[...] = e_m * pl.reciprocal(denom, approx=False)


def arcsoftmax_prepared(x, w_prep, c, s, m, *, tm=None, tc=None,
                        force_two_pass=False, operand_dtype=jnp.bfloat16):
    """Arcsoftmax forward with a pre-normalized, pre-padded w (see
    prepare_arcsoftmax_w).  c is the original (unpadded) class count."""
    n, f = x.shape
    f2, c_pad = w_prep.shape
    assert f == f2 and c_pad % 128 == 0 and c <= c_pad

    # ---- tile selection ----
    # tm up to 256 rows (256-wide MXU on v6e/v7x; fewer batch tiles == fewer
    # w re-streams).  On v7x choose tm so that ceil(n/tm) >= 2 (2 TensorCores).
    if tm is None:
        tm = min(256, _round_up(n, 8))
    tm = _round_up(tm, 8)
    if tc is None:
        tc = _pick_tc(c_pad, 1024)
    assert tc % 128 == 0 and c_pad % tc == 0

    n_pad = _round_up(n, tm)
    nb = n_pad // tm
    nc = c_pad // tc
    osize = jnp.dtype(operand_dtype).itemsize

    # ---- per-call prep (x is tiny: N x F) ----
    x32 = x.astype(jnp.float32)
    inv = jax.lax.rsqrt(
        jnp.maximum(jnp.sum(x32 * x32, axis=1, keepdims=True), 1e-24))
    xn = (x32 * inv).astype(operand_dtype)
    if n_pad != n:
        xn = jnp.pad(xn, ((0, n_pad - n), (0, 0)))

    s = jnp.float32(s)
    m = jnp.float32(m)
    pad_corr = jnp.float32(c_pad - c) * jnp.exp(-s)
    scal = jnp.stack([s, s * jnp.cos(m), s * jnp.sin(m), pad_corr]
                     ).astype(jnp.float32)

    smem_spec = pl.BlockSpec(memory_space=pltpu.MemorySpace.SMEM)
    x_spec = pl.BlockSpec((tm, f), lambda i, j: (i, 0))
    w_spec = pl.BlockSpec((f, tc), lambda i, j: (0, j))

    # Conservative VMEM estimate for the fused path (z slab + double-buffered
    # output/w/x tiles + headroom for in-kernel temporaries).
    fast_est = (nc * tm * tc * 4
                + 2 * tm * c * 4
                + 2 * f * tc * osize
                + 2 * tm * f * osize
                + 8 * tm * tc * 4)
    use_fast = (not force_two_pass) and fast_est <= _FAST_PATH_BUDGET

    if use_fast:
        # Single pass: w streamed once per batch tile, out written once,
        # z never touches HBM.  Output has the UNPADDED class extent.
        out = pl.pallas_call(
            _fused_kernel,
            out_shape=jax.ShapeDtypeStruct((n_pad, c), jnp.float32),
            grid=(nb, nc),
            in_specs=[smem_spec, x_spec, w_spec],
            out_specs=pl.BlockSpec((tm, c), lambda i, j: (i, 0)),
            scratch_shapes=[pltpu.VMEM((nc, tm, tc), jnp.float32),
                            pltpu.VMEM((tm, 1), jnp.float32)],
            compiler_params=pltpu.CompilerParams(
                dimension_semantics=("parallel", "arbitrary"),
                vmem_limit_bytes=_VMEM_LIMIT),
        )(scal, xn, w_prep)
        return out[:n] if n_pad != n else out

    # Two passes, no cosa materialization (z recomputed in pass 2).
    rowsum = pl.pallas_call(
        _rowsum_kernel,
        out_shape=jax.ShapeDtypeStruct((n_pad, 1), jnp.float32),
        grid=(nb, nc),
        in_specs=[smem_spec, x_spec, w_spec],
        out_specs=pl.BlockSpec((tm, 1), lambda i, j: (i, 0)),
        compiler_params=pltpu.CompilerParams(
            dimension_semantics=("parallel", "arbitrary"),
            vmem_limit_bytes=_VMEM_LIMIT),
    )(scal, xn, w_prep)

    out_p = pl.pallas_call(
        _ratio_kernel,
        out_shape=jax.ShapeDtypeStruct((n_pad, c_pad), jnp.float32),
        grid=(nb, nc),
        in_specs=[smem_spec, x_spec, w_spec,
                  pl.BlockSpec((tm, 1), lambda i, j: (i, 0))],
        out_specs=pl.BlockSpec((tm, tc), lambda i, j: (i, j)),
        compiler_params=pltpu.CompilerParams(
            dimension_semantics=("parallel", "parallel"),
            vmem_limit_bytes=_VMEM_LIMIT),
    )(scal, xn, w_prep, rowsum)

    if n_pad != n or c_pad != c:
        out_p = out_p[:n, :c]
    return out_p


def arcsoftmax(x, w, s, m, **kwargs):
    """Convenience one-shot wrapper.  In a training loop, call
    prepare_arcsoftmax_w once per parameter update and reuse its output with
    arcsoftmax_prepared (avoids re-normalizing/re-padding w every step)."""
    operand_dtype = kwargs.get("operand_dtype", jnp.bfloat16)
    w_prep, c = prepare_arcsoftmax_w(w, operand_dtype)
    return arcsoftmax_prepared(x, w_prep, c, s, m, **kwargs)


def _reference(x, w, s, m):
    """Plain-JAX mirror of the PyTorch forward (uses arccos explicitly)."""
    eps = 1e-12
    x_norm = x / jnp.maximum(jnp.linalg.norm(x, axis=1, keepdims=True), eps)
    w_norm = w / jnp.maximum(jnp.linalg.norm(w, axis=0, keepdims=True), eps)
    cosa = jnp.matmul(x_norm, w_norm) / 10.0
    a = jnp.arccos(cosa)
    e_margin = jnp.exp(s * jnp.cos(a + m) * 10.0)
    e_cosa = jnp.exp(s * cosa * 10.0)
    return e_margin / (jnp.sum(e_cosa, axis=1, keepdims=True)
                       - e_cosa + e_margin)


if __name__ == "__main__":
    key = jax.random.PRNGKey(0)
    k_x, k_w = jax.random.split(key)

    # Small but non-trivial: 2x2 grid, class-axis accumulation, class padding
    # (200 -> 256) with the exp(-s) correction, partial last output tile.
    batch, feature_num, cls_num = 16, 32, 200
    x = jax.random.normal(k_x, (batch, feature_num), dtype=jnp.float32)
    # Deterministic stand-in for nn.Parameter(torch.randn(feature_num, cls_num))
    w = jax.random.normal(k_w, (feature_num, cls_num), dtype=jnp.float32)
    s, m = 1.0, 0.5

    ref = _reference(x, w, s, m)

    # Parameter-side prep hoisted out of the hot path (done once).
    w_prep, c = prepare_arcsoftmax_w(w)

    # Fast path: single fused pallas_call.
    out_fast = arcsoftmax_prepared(x, w_prep, c, s, m, tm=8, tc=128)
    out_fast = jax.block_until_ready(out_fast)
    assert out_fast.shape == (batch, cls_num)
    # bf16 MXU operands -> ~1% relative error budget at s=1.
    assert jnp.allclose(out_fast, ref, rtol=5e-2, atol=1e-7), "fast path mismatch"

    # General (large-C) path: two passes with recomputed matmul.
    out_two = arcsoftmax_prepared(x, w_prep, c, s, m, tm=8, tc=128,
                                  force_two_pass=True)
    out_two = jax.block_until_ready(out_two)
    assert out_two.shape == (batch, cls_num)
    assert jnp.allclose(out_two, ref, rtol=5e-2, atol=1e-7), "two-pass mismatch"

    print("KERNEL_OK")
</pallas_src>

<mosaic_0001>
module attributes {stable_mosaic.version = 11 : i64} {
  func.func @_fused_kernel(%arg0: i32, %arg1: i32, %arg2: memref<4xf32, #tpu.memory_space<smem>>, %arg3: memref<8x32xbf16, #tpu.memory_space<vmem>>, %arg4: memref<32x128xbf16, #tpu.memory_space<vmem>>, %arg5: memref<8x200xf32, #tpu.memory_space<vmem>>, %arg6: memref<2x8x128xf32, #tpu.memory_space<vmem>>, %arg7: memref<8x1xf32, #tpu.memory_space<vmem>>) attributes {dimension_semantics = [#tpu.dimension_semantics<parallel>, #tpu.dimension_semantics<arbitrary>], iteration_bounds = array<i64: 2, 2>, scalar_prefetch = 0 : i64, scratch_operands = 2 : i64, tpu.core_type = #tpu.core_type<tc>, window_params = [{transform_indices = @transform_0, window_bounds = array<i64: 4>}, {transform_indices = @transform_1, window_bounds = array<i64: 8, 32>}, {transform_indices = @transform_2, window_bounds = array<i64: 32, 128>}, {transform_indices = @transform_3, window_bounds = array<i64: 8, 200>}]} {
    %c0 = arith.constant 0 : index
    %0 = memref.load %arg2[%c0] : memref<4xf32, #tpu.memory_space<smem>>
    %c0_i32 = arith.constant 0 : i32
    %1 = arith.cmpi eq, %arg1, %c0_i32 : i32
    %2 = arith.extui %1 : i1 to i32
    %c0_i32_0 = arith.constant 0 : i32
    %3 = arith.cmpi ne, %2, %c0_i32_0 : i32
    scf.if %3 {
      %cst_13 = arith.constant 0.000000e+00 : f32
      %24 = vector.broadcast %cst_13 : f32 to vector<8x1xf32>
      %c3 = arith.constant 3 : index
      %25 = memref.load %arg2[%c3] : memref<4xf32, #tpu.memory_space<smem>>
      %26 = vector.broadcast %25 : f32 to vector<8x1xf32>
      %27 = arith.subf %24, %26 : vector<8x1xf32>
      %c0_14 = arith.constant 0 : index
      %c0_15 = arith.constant 0 : index
      %28 = vector.load %arg7[%c0_14, %c0_15] : memref<8x1xf32, #tpu.memory_space<vmem>>, vector<8x1xf32>
      tpu.vector_store %arg7[%c0_14, %c0_15], %27 {strides = array<i32>} : memref<8x1xf32, #tpu.memory_space<vmem>>, vector<8x1xf32>,
    } else {
    }
    %c0_1 = arith.constant 0 : index
    %c0_2 = arith.constant 0 : index
    %4 = vector.load %arg3[%c0_1, %c0_2] : memref<8x32xbf16, #tpu.memory_space<vmem>>, vector<8x32xbf16>
    %c0_3 = arith.constant 0 : index
    %c0_4 = arith.constant 0 : index
    %5 = vector.load %arg4[%c0_3, %c0_4] : memref<32x128xbf16, #tpu.memory_space<vmem>>, vector<32x128xbf16>
    %cst = arith.constant dense<0.000000e+00> : vector<8x128xf32>
    %6 = tpu.matmul %4, %5, %cst {dimension_numbers = #tpu.dot_dimension_numbers<[1], [0], [0], [1], [0, 0, 1, 1], [], []>} : vector<8x32xbf16>, vector<32x128xbf16>, vector<8x128xf32> -> vector<8x128xf32>
    %7 = arith.index_cast %arg1 : i32 to index
    %c0_5 = arith.constant 0 : index
    %c0_6 = arith.constant 0 : index
    %8 = vector.load %arg6[%7, %c0_5, %c0_6] : memref<2x8x128xf32, #tpu.memory_space<vmem>>, vector<1x8x128xf32>
    %9 = vector.shape_cast %8 : vector<1x8x128xf32> to vector<8x128xf32>
    %10 = vector.shape_cast %6 : vector<8x128xf32> to vector<1x8x128xf32>
    tpu.vector_store %arg6[%7, %c0_5, %c0_6], %10 {strides = array<i32>} : memref<2x8x128xf32, #tpu.memory_space<vmem>>, vector<1x8x128xf32>,
    %c0_7 = arith.constant 0 : index
    %c0_8 = arith.constant 0 : index
    %11 = vector.load %arg7[%c0_7, %c0_8] : memref<8x1xf32, #tpu.memory_space<vmem>>, vector<8x1xf32>
    %12 = vector.broadcast %0 : f32 to vector<8x128xf32>
    %13 = arith.mulf %12, %6 : vector<8x128xf32>
    %14 = vector.broadcast %0 : f32 to vector<8x128xf32>
    %15 = arith.subf %13, %14 : vector<8x128xf32>
    %16 = math.exp %15 : vector<8x128xf32>
    %cst_9 = arith.constant dense<0.000000e+00> : vector<8xf32>
    %17 = vector.multi_reduction <add>, %16, %cst_9 [1] : vector<8x128xf32> to vector<8xf32>
    %18 = vector.shape_cast %17 : vector<8xf32> to vector<8x1xf32>
    %19 = arith.addf %11, %18 : vector<8x1xf32>
    %c0_10 = arith.constant 0 : index
    %c0_11 = arith.constant 0 : index
    %20 = vector.load %arg7[%c0_10, %c0_11] : memref<8x1xf32, #tpu.memory_space<vmem>>, vector<8x1xf32>
    tpu.vector_store %arg7[%c0_10, %c0_11], %19 {strides = array<i32>} : memref<8x1xf32, #tpu.memory_space<vmem>>, vector<8x1xf32>,
    %c1_i32 = arith.constant 1 : i32
    %21 = arith.cmpi eq, %arg1, %c1_i32 : i32
    %22 = arith.extui %21 : i1 to i32
    %c0_i32_12 = arith.constant 0 : i32
    %23 = arith.cmpi ne, %22, %c0_i32_12 : i32
    scf.if %23 {
      %c0_13 = arith.constant 0 : index
      %c0_14 = arith.constant 0 : index
      %24 = vector.load %arg7[%c0_13, %c0_14] : memref<8x1xf32, #tpu.memory_space<vmem>>, vector<8x1xf32>
      %c1 = arith.constant 1 : index
      %25 = memref.load %arg2[%c1] : memref<4xf32, #tpu.memory_space<smem>>
      %c2 = arith.constant 2 : index
      %26 = memref.load %arg2[%c2] : memref<4xf32, #tpu.memory_space<smem>>
      %c0_15 = arith.constant 0 : index
      %c0_16 = arith.constant 0 : index
      %c0_17 = arith.constant 0 : index
      %27 = vector.load %arg6[%c0_15, %c0_16, %c0_17] : memref<2x8x128xf32, #tpu.memory_space<vmem>>, vector<1x8x128xf32>
      %28 = vector.shape_cast %27 : vector<1x8x128xf32> to vector<8x128xf32>
      %29 = vector.broadcast %0 : f32 to vector<8x128xf32>
      %30 = arith.mulf %29, %28 : vector<8x128xf32>
      %31 = vector.broadcast %0 : f32 to vector<8x128xf32>
      %32 = arith.subf %30, %31 : vector<8x128xf32>
      %33 = math.exp %32 : vector<8x128xf32>
      %34 = arith.mulf %28, %28 : vector<8x128xf32>
      %cst_18 = arith.constant 1.000000e+02 : f32
      %35 = vector.broadcast %cst_18 : f32 to vector<8x128xf32>
      %36 = arith.subf %35, %34 : vector<8x128xf32>
      %cst_19 = arith.constant 0.000000e+00 : f32
      %37 = vector.broadcast %cst_19 : f32 to vector<8x128xf32>
      %38 = arith.maximumf %36, %37 : vector<8x128xf32>
      %39 = math.sqrt %38 : vector<8x128xf32>
      %40 = vector.broadcast %25 : f32 to vector<8x128xf32>
      %41 = arith.mulf %40, %28 : vector<8x128xf32>
      %42 = vector.broadcast %26 : f32 to vector<8x128xf32>
      %43 = arith.mulf %42, %39 : vector<8x128xf32>
      %44 = arith.subf %41, %43 : vector<8x128xf32>
      %45 = vector.broadcast %0 : f32 to vector<8x128xf32>
      %46 = arith.subf %44, %45 : vector<8x128xf32>
      %47 = math.exp %46 : vector<8x128xf32>
      %48 = vector.broadcast %24 : vector<8x1xf32> to vector<8x128xf32>
      %49 = arith.addf %48, %47 : vector<8x128xf32>
      %50 = arith.subf %49, %33 : vector<8x128xf32>
      %51 = tpu.reciprocal %50 : vector<8x128xf32> -> vector<8x128xf32>
      %52 = arith.mulf %47, %51 : vector<8x128xf32>
      %c0_20 = arith.constant 0 : index
      %c0_21 = arith.constant 0 : index
      %53 = vector.load %arg5[%c0_20, %c0_21] : memref<8x200xf32, #tpu.memory_space<vmem>>, vector<8x128xf32>
      tpu.vector_store %arg5[%c0_20, %c0_21], %52 {strides = array<i32>} : memref<8x200xf32, #tpu.memory_space<vmem>>, vector<8x128xf32>,
      %c1_22 = arith.constant 1 : index
      %c0_23 = arith.constant 0 : index
      %c0_24 = arith.constant 0 : index
      %54 = vector.load %arg6[%c1_22, %c0_23, %c0_24] : memref<2x8x128xf32, #tpu.memory_space<vmem>>, vector<1x8x128xf32>
      %55 = vector.shape_cast %54 : vector<1x8x128xf32> to vector<8x128xf32>
      %56 = vector.broadcast %0 : f32 to vector<8x128xf32>
      %57 = arith.mulf %56, %55 : vector<8x128xf32>
      %58 = vector.broadcast %0 : f32 to vector<8x128xf32>
      %59 = arith.subf %57, %58 : vector<8x128xf32>
      %60 = math.exp %59 : vector<8x128xf32>
      %61 = arith.mulf %55, %55 : vector<8x128xf32>
      %cst_25 = arith.constant 1.000000e+02 : f32
      %62 = vector.broadcast %cst_25 : f32 to vector<8x128xf32>
      %63 = arith.subf %62, %61 : vector<8x128xf32>
      %cst_26 = arith.constant 0.000000e+00 : f32
      %64 = vector.broadcast %cst_26 : f32 to vector<8x128xf32>
      %65 = arith.maximumf %63, %64 : vector<8x128xf32>
      %66 = math.sqrt %65 : vector<8x128xf32>
      %67 = vector.broadcast %25 : f32 to vector<8x128xf32>
      %68 = arith.mulf %67, %55 : vector<8x128xf32>
      %69 = vector.broadcast %26 : f32 to vector<8x128xf32>
      %70 = arith.mulf %69, %66 : vector<8x128xf32>
      %71 = arith.subf %68, %70 : vector<8x128xf32>
      %72 = vector.broadcast %0 : f32 to vector<8x128xf32>
      %73 = arith.subf %71, %72 : vector<8x128xf32>
      %74 = math.exp %73 : vector<8x128xf32>
      %75 = vector.broadcast %24 : vector<8x1xf32> to vector<8x128xf32>
      %76 = arith.addf %75, %74 : vector<8x128xf32>
      %77 = arith.subf %76, %60 : vector<8x128xf32>
      %78 = tpu.reciprocal %77 : vector<8x128xf32> -> vector<8x128xf32>
      %79 = arith.mulf %74, %78 : vector<8x128xf32>
      %80 = vector.extract_strided_slice %79 {offsets = [0, 0], sizes = [8, 72], strides = [1, 1]} : vector<8x128xf32> to vector<8x72xf32>
      %c0_27 = arith.constant 0 : index
      %c128 = arith.constant 128 : index
      %81 = vector.load %arg5[%c0_27, %c128] : memref<8x200xf32, #tpu.memory_space<vmem>>, vector<8x72xf32>
      tpu.vector_store %arg5[%c0_27, %c128], %80 {strides = array<i32>} : memref<8x200xf32, #tpu.memory_space<vmem>>, vector<8x72xf32>,
    } else {
    }
    return
  }
  func.func @transform_0(%arg0: i32, %arg1: i32) -> i32 {
    %c0_i32 = arith.constant 0 : i32
    %c0_i32_0 = arith.constant 0 : i32
    return %c0_i32 : i32
  }
  func.func @transform_1(%arg0: i32, %arg1: i32) -> (i32, i32) {
    %c0_i32 = arith.constant 0 : i32
    %c0_i32_0 = arith.constant 0 : i32
    return %arg0, %c0_i32 : i32, i32
  }
  func.func @transform_2(%arg0: i32, %arg1: i32) -> (i32, i32) {
    %c0_i32 = arith.constant 0 : i32
    %c0_i32_0 = arith.constant 0 : i32
    return %c0_i32, %arg1 : i32, i32
  }
  func.func @transform_3(%arg0: i32, %arg1: i32) -> (i32, i32) {
    %c0_i32 = arith.constant 0 : i32
    %c0_i32_0 = arith.constant 0 : i32
    return %arg0, %c0_i32 : i32, i32
  }
}

</mosaic_0001>

<bundles_post_ra>
// kernel: tpu_custom_call.1
= control target key start
LH: loop header
LB: loop body
LE: loop exit
PB: predicated region body
PF: predicated region fallthrough
CT: control target
= control target key end

     0   :  { %s1224_s0 = inlined_call_operand.hbm [shape: f32[4], index: 0, kind: input, shape index: {}]   ;;  %s1225_s1 = inlined_call_operand.hbm [shape: bf16[16,32], index: 1, kind: input, shape index: {}]   ;;  %s1226_s2 = inlined_call_operand.hbm [shape: bf16[32,256], index: 2, kind: input, shape index: {}]   ;;  %s1227_s3 = inlined_call_operand.hbm [shape: f32[16,200], index: 3, kind: output, shape index: {}]  }
   0x1   :  { %1238 = sst [smem:[#allocation25_spill]] %s1224_s0 }
   0x2   :  { %1239 = sst [smem:[#allocation26_spill]] %s1225_s1 }
   0x3   :  { %8 = vsyncpa [#allocation7], 0 }
   0x4   :  { %9 = vsyncpa [#allocation5], 0 }
   0x5   :  { %11 = vsyncpa [#allocation5 + $0x1], 0 }
   0x6   :  { %12 = vsyncpa [#allocation10], 0 }
   0x7   :  { %14 = vsyncpa [#allocation10 + $0x1], 0 }
   0x8   :  { %15 = vsyncpa [#allocation6], 0 }
   0x9   :  { %17 = vsyncpa [#allocation6 + $0x1], 0  ;;  %s963_s12 = smov 0   ;;  %s965_s13 = smov 0  }
   0xa   :  { %s967_s14 = smov 0   ;;  %s969_s15 = smov 0  }
   0xb   :  { %s971_s16 = smov 0   ;;  %s973_s17 = smov 0  }
   0xc   :  { %s975_s18 = smov 0   ;;  %s977_s19 = smov 0  }
   0xd   :  { %s979_s20 = smov 0   ;;  %s981_s21 = smov 0  }
   0xe   :  { %s983_s22 = smov 0  }
   0xf LB: > { %1240 = sst [smem:[#allocation16_spill]] %s908_s15  ;;  %s553_s23 = sadd.s32 4294967295, %s936_s22   ;;  %s936_s22 = sphi %s983_s22, %s23_s22   ;;  %s932_s21 = sphi %s981_s21, %s1271_s21   ;;  %s928_s20 = sphi %s979_s20, %s1278_s20   ;;  %s924_s19 = sphi %s977_s19, %s1269_s19   ;;  %s920_s18 = sphi %s975_s18, %s1277_s18   ;;  %s916_s17 = sphi %s973_s17, %s1268_s17   ;;  %s912_s16 = sphi %s971_s16, %s1276_s16   ;;  %s908_s15 = sphi %s969_s15, %s1275_s15   ;;  %s904_s14 = sphi %s967_s14, %s1274_s14   ;;  %s900_s13 = sphi %s965_s13, %s1273_s13   ;;  %s896_s12 = sphi %s963_s12, %s1272_s12  }
  0x10   : > { %1241 = sst [smem:[#allocation17_spill]] %s916_s17  ;;  %p102_p0 = scmp.ne.s32.totalorder %s900_s13, %s896_s12 }
  0x11   : > { %1242 = sst [smem:[#allocation18_spill]] %s932_s21  ;;  %p1018_p1 = scmp.eq.s32.totalorder %s553_s23, 0 }
  0x12   : > { %1243 = sst [smem:[#allocation19_spill]] %s936_s22  ;;  %p1022_p2 = scmp.eq.s32.totalorder %s553_s23, 3 }
  0x13   : > { %p555_p3 = scmp.ge.s32.totalorder %s936_s22, 1  ;;  %p139_p4 = scmp.lt.s32.totalorder %s936_s22, 5 }
  0x14   : > { %p1030_p5 = por %p102_p0, %p1018_p1  ;;  %s1248_s0 = sld [smem:[#allocation25_spill]] }
  0x15   : > { %p1034_p6 = pnand %p555_p3, %p139_p4  ;;  %s938_s4 = smov [#allocation4]  }
  0x16   : > { %s1246_s26 = scalar_select %p1030_p5, 1, 0 }
  0x17   : > { %p600_p7 = pneg %p1034_p6  ;;  %s554_s5 = sadd.s32 4294967294, %s936_s22  }
  0x18   : > { %s32_s6 = sadd.s32 1, %s928_s20  ;;  %s35_s7 = sadd.s32 1, %s932_s21 }
  0x19   : > { %p601_p8 = pnand %p600_p7, %p1018_p1  ;;  %p33_p9 = scmp.ge.s32.totalorder %s32_s6, 2 }
  0x1a   : > { %s151_s30 = sshll.u32 %s1248_s0, 4  ;;  %s63_s8 = sadd.s32 1, %s916_s17  ;;  %s152_s30 = int_to_ptr.hbm [resolvable:$true] %s151_s30 }
  0x1b   : > { %603 = dma.hbm_to_smem (!%p601_p8), %s152_s30, 16, %s938_s4, [#allocation7]  }
  0x1c   : > { %p70_p10 = scmp.ne.s32.totalorder %s916_s17, %s912_s16  ;;  %s1280_s6 = smov (%p33_p9, %s32_s6), 0 }
  0x1d   : > { %1249 = sst [smem:[#allocation20_spill]] %s1280_s6  ;;  %s1282_s7 = smov (!%p33_p9, %s35_s7), %s932_s21 }
  0x1e   : > { %p71_p11 = scmp.eq.s32.totalorder %s936_s22, 0  ;;  %p1228_p12 = scmp.ne.s32.totalorder %s912_s16, %s908_s15 }
  0x1f   : > { %p37_p13 = scmp.ge.s32.totalorder %s1282_s7, 2  ;;  %s86_s9 = ssub.s32 %s928_s20, %s1280_s6 }
  0x20   : > { %p1064_p0 = por %p71_p11, %p70_p10  ;;  %p1073_p3 = por %p1018_p1, %p1228_p12 }
  0x21   : > { %s1284_s7 = smov (%p37_p13, %s1282_s7), 0  ;;  %p87_p4 = scmp.eq.s32.totalorder %s86_s9, 0 }
  0x22   : > { %1252 = sst [smem:[#allocation21_spill]] %s1284_s7  ;;  %s89_s12 = sadd.s32 1, %s904_s14 }
  0x23   : > { %s60_s23 = ssub.s32 %s932_s21, %s1284_s7  ;;  %p96_p7 = scmp.ne.s32.totalorder %s904_s14, %s900_s13 }
  0x24   : > { %p61_p8 = scmp.eq.s32.totalorder %s60_s23, 0  ;;  %p1089_p9 = por %p1022_p2, %p70_p10 }
  0x25   : > { %s1094_s29 = scalar_select %p87_p4, %s904_s14, %s89_s12  }
  0x26   : > { %s1097_s30 = scalar_select %p61_p8, %s916_s17, %s63_s8  }
  0x27   : > { %1254 = sst [smem:[#allocation22_spill]] %s1094_s29  ;;  %p1101_p13 = por %p96_p7, %p71_p11 }
  0x28   : > { %1255 = sst [smem:[#allocation23_spill]] %s1097_s30  ;;  %p132_p12 = scmp.eq.s32.totalorder %s554_s5, 3 }
  0x29   : > { %p616_p5 = scmp.lt.s32.totalorder %s936_s22, 4  ;;  %s162_s25 = sand.u32 1, %s916_s17  }
  0x2a   : > { %p1257_p2 = scmp.ne.s32.totalorder %s912_s16, %s908_s15  ;;  %s558_s12 = sshll.u32 %s162_s25, 2 }
  0x2b   : > { %s559_s23 = sshll.u32 %s932_s21, 2  ;;  %s1260_s1 = sld [smem:[#allocation26_spill]] }
  0x2c   : > { %p1110_p10 = por %p132_p12, %p1257_p2  ;;  %s166_s30 = scalar_lea.vmem [#allocation8], %s558_s12 }
  0x2d   : > { %s174_s29 = sshll.u32 %s166_s30, 4  ;;  %p605_p11 = pnand %p616_p5, %p1064_p0  ;;  %s175_s29 = int_to_ptr.vmem [resolvable:$true] %s174_s29 }
  0x2e   : > { %s1258_s9 = scalar_select %p1110_p10, 1, 0 }
  0x2f   : > { %p1122_p4 = pnand %p616_p5, %p1101_p13  ;;  %s181_s17 = sand.u32 1, %s904_s14  }
  0x30   : > { %1259 = sst [smem:[#allocation24_spill]] %s1258_s9  ;;  %s561_s9 = sshll.u32 %s928_s20, 2 }
  0x31   : > { %s170_s7 = scalar_lea.hbm %s1260_s1, %s559_s23  ;;  %s163_s21 = scalar_lea.sflag [#allocation5], %s162_s25 }
  0x32   : > { %s172_s6 = sshll.u32 %s170_s7, 4  ;;  %s560_s15 = sshll.u32 %s181_s17, 4  ;;  %s173_s6 = int_to_ptr.hbm [resolvable:$true] %s172_s6 }
  0x33   : > { %607 = dma.hbm_to_vmem [thread:$0]  (!%p605_p11), %s173_s6, 64, %s175_s29, %s163_s21  }
  0x34   : > { %s189_s7 = scalar_lea.hbm %s1226_s2, %s561_s9  ;;  %s185_s12 = scalar_lea.vmem [#allocation9], %s560_s15 }
  0x35   : > { %s190_s30 = sshll.u32 %s189_s7, 4  ;;  %s192_s8 = sshll.u32 %s185_s12, 4  ;;  %s191_s30 = int_to_ptr.hbm [resolvable:$true] %s190_s30  ;;  %s193_s8 = int_to_ptr.vmem [resolvable:$true] %s192_s8 }
  0x36   : > { %s182_s10 = scalar_lea.sflag [#allocation10], %s181_s17  ;;  %s939_s4 = smov 128  }
  0x37   : > { %s940_s1 = smov 64   ;;  %s941_s22 = smov 4  }
  0x38   : > { %610 = dma.hbm_to_vmem [thread:$0]  (!%p1122_p4), %s191_s30, 256, %s193_s8, %s182_s10, %s939_s4, %s940_s1, %s941_s22  }
  0x39   : > { %204 = sbr.rel (%p1034_p6) target bundleno = 513 (0x201), region = 32 }
  0x3e   : > { %879 = dma.done.wait (%p1018_p1), [#allocation7], 16  }
  0x3f   : > { %881 = vsyncadd (%p1018_p1), [#allocation7], 4294967280  ;;  %s1140_s15 = sand.u32 1, %s912_s16  }
  0x40   : > { %s564_s17 = sshll.u32 %s1140_s15, 2  ;;  %s212_s21 = scalar_lea.sflag [#allocation5], %s1140_s15 }
  0x41   : > { %s215_s6 = scalar_lea.vmem [#allocation8], %s564_s17 }
  0x42   : > { %883 = dma.done.wait (%p1073_p3), %s212_s21, 64  }
  0x43   : > { %885 = vsyncadd (%p1073_p3), %s212_s21, 4294967232  ;;  %s221_s1 = sand.u32 1, %s900_s13   ;;  %p1262_p1 = scmp.ne.s32.totalorder %s1246_s26, 0 }
  0x44   : > { %s565_s22 = sshll.u32 %s221_s1, 4  ;;  %s222_s24 = scalar_lea.sflag [#allocation10], %s221_s1 }
  0x45   : > { %s225_s27 = scalar_lea.vmem [#allocation9], %s565_s22 }
  0x46   : > { %887 = dma.done.wait (%p1262_p1), %s222_s24, 256  }
  0x47   : > { %889 = vsyncadd (%p1262_p1), %s222_s24, 4294967040 }
  0x48   : > { %231 = sfence }
  0x49   : > { %s566_s29 = sshll.u32 %s1140_s15, 4  ;;  %s256_s25 = sld [smem:[#allocation4]] }
  0x4a   : > { %s1154_s9 = scalar_lea.vmem [#allocation11], %s566_s29  ;;  %p567_p5 = scmp.ne.s32.totalorder %s920_s18, 0 }
  0x4b   : > { %s568_s11 = sld [smem:[#allocation4 + $0x3]] (!%p567_p5) }
  0x4c   : > { %260 = sbr.rel (%p567_p5) target bundleno = 85 (0x55), region = 48 }
  0x51   : > { %v262_v0 = vstv %s568_s11  ;;  %vm264_vm0 = vcmask 7168  }
  0x52   : > { %v263_v1 = vsub.f32 0.0, %v262_v0 }
  0x54   : > { %265 = vst.msk [vmem:[#allocation3] sm:$0xff] %vm264_vm0, %v263_v1 }
  0x55 PF: > { %v588_v2 = vld [vmem:[%s225_s27 + $0x8] sm:$0xff]  ;;  %v587_v3 = vld [vmem:[%s225_s27] sm:$0xff]  ;;  %vm283_vm1 = vcmask 261120   ;;  %s578_s26 = sshll.u32 %s920_s18, 3  ;;  %v1158_v5 = vstv %s256_s25  ;;  %vm312_vm2 = vcmask 7168   ;;  %p579_p6 = scmp.ne.s32.totalorder %s920_s18, 1 }
  0x56   : > { %293 = vmatpush.bf16.msra.mxu0 %v588_v2  ;;  %v266_v4 = vld [vmem:[%s215_s6] sm:$0xf]  ;;  %s301_s5 = scalar_lea.vmem [#allocation2], %s578_s26  ;;  %s580_s18 = sld [smem:[#allocation4 + $0x1]] (!%p579_p6) }
  0x57   : > { %s581_s0 = sld [smem:[#allocation4 + $0x2]] (!%p579_p6) }
  0x5a   : > { %294 = vmatpush.bf16.msra.mxu0 %v587_v3 }
  0x5b   : > { %v303_v12 = vld [vmem:[#allocation3] sm:$0xff] }
  0x5d   : > { %577 = vmatmul.msk.bf16.vlgmr.msra.gmra.mxu0 %vm283_vm1, %v266_v4 }
  0xda   : > { %v296_v6 = vpop.f32.mrf.mxu0 }
  0xdb   : > { %302 = vst [vmem:[%s301_s5] sm:$0xff] %v296_v6  ;;  %v305_v7 = vmul.f32 %v1158_v5, %v296_v6 }
  0xdd   : > { %v306_v8 = vsub.f32 %v305_v7, %v1158_v5 }
  0xdf   : > { %v307_v9 = vmul.f32 1.442695, %v306_v8 }
  0xe1   : > { %712 = vpow2.f32 %v307_v9 }
  0xe2   : > { %v298_v10 = vpop.f32.mrf.mxu0 }
  0xe7   : > { %v713_v11 = vpop.eup %712 }
  0xe8   : > { %309 = vadd.xlane.f32.xlu0 %v713_v11 }
 0x15a   : > { %317 = sbr.rel (%p579_p6) target bundleno = 498 (0x1f2), region = 52 }
 0x15b   : > { %v310_v13 = vpop.xlane.xlu0 %309 }
 0x15c   : > { %v311_v14 = vadd.f32 %v310_v13, %v303_v12 }
 0x15e   : > { %313 = vst.msk [vmem:[#allocation3] sm:$0xff] %vm312_vm2, %v311_v14 }
 0x15f   : > { %v942_v16 = vmov 0   ;;  %v321_v17 = vld [vmem:[#allocation2] sm:$0xff]  ;;  %v373_v18 = vld [vmem:[#allocation2 + $0x8] sm:$0xff]  ;;  %v341_v44 = vstv %s580_s18  ;;  %v343_v45 = vstv %s581_s0  ;;  %vm416_vm15 = vcmask 588800  }
 0x160   : > { %714 = vset.pattern.permute.xlu0 %v942_v16  ;;  %v326_v19 = vmul.f32 %v321_v17, %v321_v17  ;;  %v378_v20 = vmul.f32 %v373_v18, %v373_v18  ;;  %v342_v47 = vmul.f32 %v341_v44, %v321_v17  ;;  %v393_v49 = vmul.f32 %v373_v18, %v341_v44 }
 0x161   : > { %v322_v53 = vmul.f32 %v321_v17, %v1158_v5  ;;  %v374_v54 = vmul.f32 %v373_v18, %v1158_v5 }
 0x162   : > { %v327_v21 = vsub.f32 100.0, %v326_v19  ;;  %v379_v22 = vsub.f32 100.0, %v378_v20 }
 0x163   : > { %v323_v57 = vsub.f32 %v322_v53, %v1158_v5  ;;  %v375_v58 = vsub.f32 %v374_v54, %v1158_v5 }
 0x164   : > { %v328_v23 = vmax.f32 %v327_v21, 0.0  ;;  %v380_v24 = vmax.f32 %v379_v22, 0.0 }
 0x165   : > { %v318_v15 = vld [vmem:[#allocation3] sm:$0xff]  ;;  %v324_v61 = vmul.f32 1.442695, %v323_v57  ;;  %v376_v62 = vmul.f32 1.442695, %v375_v58 }
 0x166   : > { %351 = vperm.xlu0 %714, %v318_v15   ;;  %715 = vrsqrt.f32 %v328_v23  ;;  %vm336_vm3 = vcmp.eq.f32.partialorder %v328_v23, inf  ;;  %vm388_vm4 = vcmp.eq.f32.partialorder %v380_v24, inf  ;;  %v339_v39 = vand.u32 2147483648, %v328_v23 }
 0x167   : > { %717 = vrsqrt.f32 %v380_v24  ;;  %vm338_vm5 = vcmp.eq.f32.partialorder %v328_v23, 0.0  ;;  %v391_v41 = vand.u32 2147483648, %v380_v24  ;;  %vm390_vm6 = vcmp.eq.f32.partialorder %v380_v24, 0.0 }
 0x16c   : > { %v716_v25 = vpop.eup %715 }
 0x16d   : > { %v718_v26 = vpop.eup %717  ;;  %v330_v27 = vmul.f32 %v716_v25, %v328_v23 }
 0x16e   : > { %v382_v28 = vmul.f32 %v718_v26, %v380_v24 }
 0x16f   : > { %v331_v29 = vmul.f32 %v716_v25, %v330_v27 }
 0x170   : > { %v383_v30 = vmul.f32 %v718_v26, %v382_v28 }
 0x171   : > { %v332_v31 = vmul.f32 0.5, %v331_v29 }
 0x172   : > { %v384_v32 = vmul.f32 0.5, %v383_v30 }
 0x173   : > { %v333_v33 = vsub.f32 1.5, %v332_v31 }
 0x174   : > { %v385_v34 = vsub.f32 1.5, %v384_v32 }
 0x175   : > { %v334_v35 = vmul.f32 %v716_v25, %v333_v33 }
 0x176   : > { %v386_v36 = vmul.f32 %v718_v26, %v385_v34 }
 0x177   : > { %v335_v37 = vmul.f32 %v334_v35, %v328_v23 }
 0x178   : > { %v387_v38 = vmul.f32 %v386_v36, %v380_v24 }
 0x179   : > { %v337_v40 = vsel %vm336_vm3, %v328_v23, %v335_v37 }
 0x17a   : > { %v389_v42 = vsel %vm388_vm4, %v380_v24, %v387_v38  ;;  %v340_v43 = vsel %vm338_vm5, %v339_v39, %v337_v40 }
 0x17b   : > { %v392_v46 = vsel %vm390_vm6, %v391_v41, %v389_v42  ;;  %v344_v48 = vmul.f32 %v343_v45, %v340_v43 }
 0x17c   : > { %v394_v50 = vmul.f32 %v392_v46, %v343_v45 }
 0x17d   : > { %v345_v51 = vsub.f32 %v342_v47, %v344_v48 }
 0x17e   : > { %v395_v52 = vsub.f32 %v393_v49, %v394_v50 }
 0x17f   : > { %v346_v55 = vsub.f32 %v345_v51, %v1158_v5 }
 0x180   : > { %v396_v56 = vsub.f32 %v395_v52, %v1158_v5 }
 0x181   : > { %v347_v59 = vmul.f32 1.442695, %v346_v55 }
 0x182   : > { %v397_v60 = vmul.f32 1.442695, %v396_v56 }
 0x183   : > { %719 = vpow2.f32 %v347_v59 }
 0x184   : > { %721 = vpow2.f32 %v397_v60 }
 0x185   : > { %723 = vpow2.f32 %v324_v61 }
 0x186   : > { %725 = vpow2.f32 %v376_v62 }
 0x189   : > { %v720_v63 = vpop.eup %719 }
 0x18a   : > { %v722_v0 = vpop.eup %721 }
 0x18b   : > { %v724_v1 = vpop.eup %723 }
 0x18c   : > { %v726_v2 = vpop.eup %725 }
 0x1d8   : > { %v352_v3 = vpop.permute.xlu0 %351 }
 0x1d9   : > { %v354_v4 = vadd.f32 %v720_v63, %v352_v3  ;;  %v399_v6 = vadd.f32 %v722_v0, %v352_v3 }
 0x1db   : > { %v355_v7 = vsub.f32 %v354_v4, %v724_v1  ;;  %v400_v8 = vsub.f32 %v399_v6, %v726_v2 }
 0x1dd   : > { %727 = vrcp.f32 %v355_v7  ;;  %v367_v13 = vand.u32 2147483648, %v355_v7  ;;  %v365_v16 = vand.u32 2147483647, %v355_v7  ;;  %v412_v17 = vand.u32 2147483648, %v400_v8 }
 0x1de   : > { %729 = vrcp.f32 %v400_v8  ;;  %v410_v19 = vand.u32 2147483647, %v400_v8  ;;  %vm361_vm9 = vweird.f32 %v355_v7  ;;  %vm406_vm11 = vweird.f32 %v400_v8 }
 0x1df   : > { %v368_v21 = vor.u32 1.1754944e-38, %v367_v13  ;;  %vm366_vm12 = vcmp.eq.f32.partialorder %v365_v16, 8.507059e+37  ;;  %v413_v24 = vor.u32 1.1754944e-38, %v412_v17 }
 0x1e0   : > { %vm411_vm14 = vcmp.eq.f32.partialorder %v410_v19, 8.507059e+37 }
 0x1e3   : > { %v728_v5 = vpop.eup %727 }
 0x1e4   : > { %v730_v9 = vpop.eup %729  ;;  %v357_v10 = vmul.f32 %v728_v5, %v355_v7  ;;  %vm362_vm7 = vweird.f32 %v728_v5 }
 0x1e5   : > { %v402_v11 = vmul.f32 %v730_v9, %v400_v8  ;;  %vm407_vm8 = vweird.f32 %v730_v9  ;;  %vm363_vm10 = vmor %vm361_vm9, %vm362_vm7 }
 0x1e6   : > { %v358_v12 = vsub.f32 1.0, %v357_v10  ;;  %vm408_vm13 = vmor %vm406_vm11, %vm407_vm8 }
 0x1e7   : > { %v403_v14 = vsub.f32 1.0, %v402_v11 }
 0x1e8   : > { %v359_v15 = vmul.f32 %v728_v5, %v358_v12 }
 0x1e9   : > { %v404_v18 = vmul.f32 %v730_v9, %v403_v14 }
 0x1ea   : > { %v360_v20 = vadd.f32 %v728_v5, %v359_v15 }
 0x1eb   : > { %v405_v22 = vadd.f32 %v730_v9, %v404_v18 }
 0x1ec   : > { %v364_v23 = vsel %vm363_vm10, %v728_v5, %v360_v20 }
 0x1ed   : > { %v369_v25 = vsel %vm366_vm12, %v368_v21, %v364_v23  ;;  %v409_v26 = vsel %vm408_vm13, %v730_v9, %v405_v22 }
 0x1ee   : > { %v370_v27 = vmul.f32 %v720_v63, %v369_v25  ;;  %v414_v28 = vsel %vm411_vm14, %v413_v24, %v409_v26 }
 0x1ef   : > { %v415_v29 = vmul.f32 %v722_v0, %v414_v28 }
 0x1f0   : > { %371 = vst [vmem:[%s1154_s9] sm:$0xff] %v370_v27 }
 0x1f1   : > { %417 = vst.msk [vmem:[%s1154_s9 + $0x8] sm:$0xff] %vm416_vm15, %v415_v29 }
 0x1f2 PF: > { %s589_s23 = sshll.u32 %s924_s19, 4  ;;  %s432_s8 = sshll.u32 %s1154_s9, 4  ;;  %s433_s8 = int_to_ptr.vmem [resolvable:$true] %s432_s8 }
 0x1f3   : > { %s430_s12 = scalar_lea.hbm %s1227_s3, %s589_s23  ;;  %s419_s4 = scalar_lea.sflag [#allocation6], %s1140_s15 }
 0x1f4   : > { %s434_s10 = sshll.u32 %s430_s12, 4  ;;  %s826_s19 = scalar_lea.hbm %s1227_s3, 32  ;;  %s435_s10 = int_to_ptr.hbm [resolvable:$true] %s434_s10 }
 0x1f5   : > { %s820_s17 = sshra.s32 %s435_s10, 4  ;;  %s821_s17 = int_to_ptr.hbm [resolvable:$true] %s820_s17 }
 0x1f6   : > { %s822_s21 = scalar_lea.hbm %s821_s17, 16  ;;  %p827_p7 = scmp.lt.s32.totalorder %s821_s17, %s1227_s3 }
 0x1f7   : > { %p823_p12 = scmp.ne.s32.totalorder %s821_s17, %s822_s21  ;;  %p828_p8 = scmp.lt.s32.totalorder %s826_s19, %s822_s21 }
 0x1f9   : > { %p824_p0 = pnand %p823_p12, %p1089_p9  ;;  %p829_p13 = por %p828_p8, %p827_p7 }
 0x1fb   : > { %p825_p3 = pneg %p824_p0 }
 0x1fd   : > { %p830_p2 = pnand %p829_p13, %p825_p3 }
 0x1ff   : > { %833 = shalt.err (!%p830_p2)
}
 0x200   : > { %598 = dma.vmem_to_hbm [thread:$0]  (%p1089_p9), %s433_s8, 256, %s435_s10, %s419_s4  }
 0x201 PF: > { %s1263_s15 = sld [smem:[#allocation19_spill]] }
 0x202   : > { %s1264_s27 = sld [smem:[#allocation16_spill]] }
 0x207   : > { %p618_p11 = scmp.ge.s32.totalorder %s1263_s15, 2 }
 0x208   : > { %s446_s25 = sand.u32 1, %s1264_s27  }
 0x209   : > { %p612_p4 = pnand %p618_p11, %p1110_p10  ;;  %s447_s9 = scalar_lea.sflag [#allocation6], %s446_s25 }
 0x20b   : > { %p613_p1 = pneg %p612_p4 }
 0x20d   : > { %891 = dma.done.wait (%p613_p1), %s447_s9, 256  }
 0x20e   : > { %893 = vsyncadd (%p613_p1), %s447_s9, 4294967040  ;;  %s23_s22 = sadd.s32 1, %s1263_s15   ;;  %s1266_s11 = sld [smem:[#allocation22_spill]] }
 0x20f   : > { %p20_p5 = scmp.ge.s32.totalorder %s23_s22, 6   ;;  %s1267_s28 = sld [smem:[#allocation17_spill]] }
 0x210   : > { %s1268_s17 = sld [smem:[#allocation23_spill]]  ;;  %s1272_s12 = smov %s900_s13 }
 0x211   : > { %s1269_s19 = sld [smem:[#allocation18_spill]]  ;;  %s1273_s13 = smov %s904_s14 }
 0x212   : > { %s1270_s26 = sld [smem:[#allocation20_spill]]  ;;  %s1275_s15 = smov %s912_s16 }
 0x213   : > { %s1271_s21 = sld [smem:[#allocation21_spill]]  ;;  %s1277_s18 = smov %s928_s20 }
 0x214   : > { %s1274_s14 = smov %s1266_s11  ;;  %22 = sbr.rel (!%p20_p5) target bundleno = 15 (0xf), region = 105 }
 0x215   : > { %s1276_s16 = smov %s1267_s28 }
 0x218   : > { %s1278_s20 = smov %s1270_s26 }
 0x219   :  { %453 = vsyncpa [#allocation5], 1 }
 0x21a   :  { %455 = vsyncpa [#allocation5 + $0x1], 1 }
 0x21b   :  { %456 = vsyncpa [#allocation10], 1 }
 0x21c   :  { %458 = vsyncpa [#allocation10 + $0x1], 1 }
 0x21d   :  { %459 = vsyncpa [#allocation6], 1 }
 0x21e   :  { %461 = vsyncpa [#allocation6 + $0x1], 1 }
 0x21f   :  { %462 = vsyncpa [#allocation7], 1 }
 0x220   :  { %464 = vsyncpa [#allocation7 + $0x1], 1 }

</bundles_post_ra>
